<compile_context>
chip_gen: v6e
topology: v6e:2x2x1
jax: 0.10.0
libtpu: 0.0.40
codegen_flags: <defaults>
</compile_context>

<pallas_src>
import functools

import jax
import jax.numpy as jnp
from jax.experimental import pallas as pl
from jax.experimental.pallas import tpu as pltpu


def _round_up(x, m):
    return ((x + m - 1) // m) * m


# ----------------------------- fused weighted-CE kernel --------------------------------
def _fused_wce_kernel(x_ref, t_ref, den_ref, nll_ref, cnt_ref, *, ignore_index, hw_total):
    """One (C, RT, 128) tile of one batch element -> per-class partial sums.

    den[c] += sum_m softmax(x)[c, m]                (all real pixels -> class weights)
    nll[c] += sum_{valid m, t=c} -log softmax[c, m] (weighted-CE numerator pieces)
    cnt[c] += #{valid m, t=c}                       (weighted-CE weight-sum pieces)
    """
    core = pl.program_id(0)          # core split of the row-tile range (v7x only)
    n = pl.program_id(1)             # batch element              (reduction axis)
    tile = pl.program_id(2)          # row tile within this core  (reduction axis)

    @pl.when((n == 0) & (tile == 0))
    def _():
        den_ref[...] = jnp.zeros_like(den_ref)
        nll_ref[...] = jnp.zeros_like(nll_ref)
        cnt_ref[...] = jnp.zeros_like(cnt_ref)

    C, RT, L = x_ref.shape           # L == 128 lanes
    ACC_R = den_ref.shape[1]

    # Logical (un-clamped) tile index: ragged last tiles and clamped duplicate tiles
    # (odd tile counts under the core split) contribute zero through this mask.
    lt = core * pl.num_programs(2) + tile
    row = jax.lax.broadcasted_iota(jnp.int32, (RT, L), 0) + lt * RT
    lane = jax.lax.broadcasted_iota(jnp.int32, (RT, L), 1)
    in_bounds = (row * L + lane) < hw_total                          # (RT, 128)

    t = t_ref[...].astype(jnp.int32)                                 # (RT, 128)
    valid = in_bounds & (t != ignore_index)

    # Softmax over the class axis as an unrolled C-length loop of elementwise ops on
    # full (RT, 128) slabs: full (8,128) vreg occupancy, no cross-sublane XLU reduce.
    xs = [jnp.where(in_bounds, x_ref[c].astype(jnp.float32), 0.0) for c in range(C)]
    mx = xs[0]
    for c in range(1, C):
        mx = jnp.maximum(mx, xs[c])
    es = [jnp.exp(xs[c] - mx) for c in range(C)]                     # EUP
    s = es[0]
    for c in range(1, C):
        s = s + es[c]
    r = pl.reciprocal(s, approx=True)        # EUP fast reciprocal
    r = r * (2.0 - s * r)                    # one Newton step (cheap VPU, ~exact)
    rm = jnp.where(in_bounds, r, 0.0)        # zero padded pixels once, for all classes
    lse = mx + jnp.log(s)                    # shifted log-sum-exp; -logp[c] = lse - x[c]

    def fold_rows(v):                        # (RT, 128) -> (ACC_R, 128), pure VPU adds
        if RT == ACC_R:
            return v
        return v.reshape(RT // ACC_R, ACC_R, L).sum(axis=0)

    for c in range(C):
        hit = valid & (t == c)
        den_ref[c] += fold_rows(es[c] * rm)
        nll_ref[c] += fold_rows(jnp.where(hit, lse - xs[c], 0.0))
        cnt_ref[c] += fold_rows(jnp.where(hit, 1.0, 0.0))


# ------------------------------- hardware-aware knobs -----------------------------------
def _num_tensorcores():
    try:
        kind = jax.devices()[0].device_kind.lower()
    except Exception:
        return 1
    return 2 if ("v7" in kind or "tpu7" in kind) else 1


def _vmem_budget():
    try:
        cap = int(pltpu.get_tpu_info().vmem_capacity_bytes)
    except Exception:
        cap = 64 * 1024 * 1024
    if cap <= 64 * 1024 * 1024:          # v7x-class: 64 MiB per TensorCore
        return 24 << 20, 48 << 20        # (double-buffered working set, vmem_limit_bytes)
    return 48 << 20, 80 << 20            # v5e/v6e: 128 MiB


# ----------------------------------- wrapper --------------------------------------------
def weighted_cross_entropy_loss(logits, target, ignore_index=-1):
    N, C = logits.shape[0], logits.shape[1]
    HW = 1
    for s in logits.shape[2:]:
        HW *= s

    # Flatten spatial dims only (free, row-major). The reference's NCHW->(C,M) permute is
    # expressed through grid/BlockSpec instead of materialized; dtype stays native.
    x = logits.reshape(N, C, HW)
    t = target.reshape(N, HW)

    HW_pad = _round_up(HW, 128)
    if HW_pad != HW:
        # TODO(synk): misaligned spatial sizes fall back to a materialized pad.
        x = jnp.pad(x, ((0, 0), (0, 0), (0, HW_pad - HW)))
        t = jnp.pad(t, ((0, 0), (0, HW_pad - HW)), constant_values=ignore_index)
    R = HW_pad // 128
    x4 = x.reshape(N, C, R, 128)          # free reshape: lane- and sublane-dense layout
    t3 = t.reshape(N, R, 128)

    # ---- byte-sized tiling under a generation-aware VMEM budget ----
    in_budget, vmem_limit = _vmem_budget()
    row_bytes = 128 * (C * x4.dtype.itemsize + t3.dtype.itemsize)
    block_budget = min(in_budget // 2, 4 << 20)       # 2x-buffered inputs, <=~4 MiB/block
    rt = max(1, block_budget // row_bytes)
    if R >= 8:
        rt = max(8, min((rt // 8) * 8, (R // 8) * 8))  # multiple of 8 sublanes
    else:
        rt = R                                         # full (small) row range
    acc_r = 8 if (rt >= 8 and rt % 8 == 0) else rt

    n_row_tiles = pl.cdiv(R, rt)
    n_cores = min(_num_tensorcores(), n_row_tiles)     # 1 on v5e/v6e, 2 on v7x
    tiles_per_core = pl.cdiv(n_row_tiles, n_cores)
    last = n_row_tiles - 1

    # Clamp block indices so (possibly) out-of-range duplicate tiles re-read the last
    # block; their contribution is zeroed in-kernel via the logical-index mask.
    def x_map(core, n, i):
        return (n, 0, jnp.minimum(core * tiles_per_core + i, last), 0)

    def t_map(core, n, i):
        return (n, jnp.minimum(core * tiles_per_core + i, last), 0)

    def acc_map(core, n, i):
        return (core, 0, 0, 0)

    kern = functools.partial(_fused_wce_kernel, ignore_index=ignore_index, hw_total=HW)
    acc_shape = jax.ShapeDtypeStruct((n_cores, C, acc_r, 128), jnp.float32)
    acc_spec = pl.BlockSpec((None, C, acc_r, 128), acc_map)

    den, nll, cnt = pl.pallas_call(
        kern,
        out_shape=(acc_shape, acc_shape, acc_shape),
        grid=(n_cores, N, tiles_per_core),
        in_specs=[pl.BlockSpec((None, C, rt, 128), x_map),
                  pl.BlockSpec((None, rt, 128), t_map)],
        out_specs=(acc_spec, acc_spec, acc_spec),
        compiler_params=pltpu.CompilerParams(
            dimension_semantics=("parallel", "arbitrary", "arbitrary"),
            vmem_limit_bytes=vmem_limit),
    )(x4, t3)

    # ---- glue: per-class sums -> class weights -> weighted CE (all (C,)-sized) ----
    den_c = den.sum(axis=(0, 2, 3))                 # Sum_m p[c, m]
    nll_c = nll.sum(axis=(0, 2, 3))                 # Sum_{valid m, t=c} -logp[c, m]
    cnt_c = cnt.sum(axis=(0, 2, 3))                 # #{valid m, t=c}

    m_total = jnp.float32(N * HW)
    nom_c = m_total - den_c                         # Sum_m (1 - p[c, m])
    # Guard classes absent from the batch (reference would produce inf/NaN there;
    # present classes are numerically unaffected).
    class_w = nom_c / jnp.maximum(den_c, 1e-12)

    num = jnp.sum(class_w * nll_c)                  # Sum over valid pixels of w[t]*(-logp[t])
    wsum = jnp.sum(class_w * cnt_c)                 # Sum over valid pixels of w[t]
    return num / wsum


# ------------------------------ pure-JAX reference ---------------------------------------
def reference_loss(logits_nchw, target_nhw, ignore_index=-1):
    C = logits_nchw.shape[1]
    p = jax.nn.softmax(logits_nchw, axis=1)
    flat = jnp.transpose(p, (1, 0, 2, 3)).reshape(C, -1)
    w = (1.0 - flat).sum(-1) / flat.sum(-1)
    logp = jax.nn.log_softmax(logits_nchw, axis=1)
    logp_cm = jnp.transpose(logp, (1, 0, 2, 3)).reshape(C, -1)
    t = target_nhw.reshape(-1)
    valid = (t != ignore_index)
    t_safe = jnp.where(valid, t, 0)
    picked = logp_cm[t_safe, jnp.arange(t.shape[0])]
    wl = w[t_safe] * valid.astype(jnp.float32)
    return jnp.sum(-wl * picked) / jnp.sum(wl)


if __name__ == "__main__":
    key = jax.random.PRNGKey(0)
    k1, k2, k3 = jax.random.split(key, 3)

    N, C, H, W = 2, 4, 16, 16
    logits = jax.random.normal(k1, (N, C, H, W), dtype=jnp.float32)
    target = jax.random.randint(k2, (N, H, W), 0, C, dtype=jnp.int32)
    # sprinkle in some ignore_index (-1) pixels
    ignore_mask = jax.random.bernoulli(k3, 0.1, (N, H, W))
    target = jnp.where(ignore_mask, -1, target)

    loss = weighted_cross_entropy_loss(logits, target, ignore_index=-1)
    loss = jax.block_until_ready(loss)

    ref = jax.block_until_ready(reference_loss(logits, target, ignore_index=-1))
    assert jnp.allclose(loss, ref, rtol=1e-4, atol=1e-5), (loss, ref)

    print("KERNEL_OK")
</pallas_src>

<mosaic_0001>
module attributes {stable_mosaic.version = 11 : i64} {
  func.func @_fused_wce_kernel(%arg0: i32, %arg1: i32, %arg2: i32, %arg3: memref<1x4x2x128xf32, #tpu.memory_space<vmem>>, %arg4: memref<1x2x128xi32, #tpu.memory_space<vmem>>, %arg5: memref<1x4x2x128xf32, #tpu.memory_space<vmem>>, %arg6: memref<1x4x2x128xf32, #tpu.memory_space<vmem>>, %arg7: memref<1x4x2x128xf32, #tpu.memory_space<vmem>>) attributes {dimension_semantics = [#tpu.dimension_semantics<parallel>, #tpu.dimension_semantics<arbitrary>, #tpu.dimension_semantics<arbitrary>], iteration_bounds = array<i64: 1, 2, 1>, scalar_prefetch = 0 : i64, scratch_operands = 0 : i64, tpu.core_type = #tpu.core_type<tc>, window_params = [{transform_indices = @transform_0, window_bounds = array<i64: 1, 4, 2, 128>}, {transform_indices = @transform_1, window_bounds = array<i64: 1, 2, 128>}, {transform_indices = @transform_2, window_bounds = array<i64: 1, 4, 2, 128>}, {transform_indices = @transform_3, window_bounds = array<i64: 1, 4, 2, 128>}, {transform_indices = @transform_4, window_bounds = array<i64: 1, 4, 2, 128>}]} {
    %c0_i32 = arith.constant 0 : i32
    %0 = arith.cmpi eq, %arg1, %c0_i32 : i32
    %c0_i32_0 = arith.constant 0 : i32
    %1 = arith.cmpi eq, %arg2, %c0_i32_0 : i32
    %2 = arith.andi %0, %1 : i1
    %3 = arith.extui %2 : i1 to i32
    %c0_i32_1 = arith.constant 0 : i32
    %4 = arith.cmpi ne, %3, %c0_i32_1 : i32
    scf.if %4 {
      %cst_133 = arith.constant 0.000000e+00 : f32
      %173 = vector.broadcast %cst_133 : f32 to vector<4x2x128xf32>
      %c0_134 = arith.constant 0 : index
      %c0_135 = arith.constant 0 : index
      %c0_136 = arith.constant 0 : index
      %c0_137 = arith.constant 0 : index
      %174 = vector.load %arg5[%c0_134, %c0_135, %c0_136, %c0_137] : memref<1x4x2x128xf32, #tpu.memory_space<vmem>>, vector<1x4x2x128xf32>
      %175 = vector.shape_cast %174 : vector<1x4x2x128xf32> to vector<4x2x128xf32>
      %176 = vector.shape_cast %173 : vector<4x2x128xf32> to vector<1x4x2x128xf32>
      tpu.vector_store %arg5[%c0_134, %c0_135, %c0_136, %c0_137], %176 {strides = array<i32>} : memref<1x4x2x128xf32, #tpu.memory_space<vmem>>, vector<1x4x2x128xf32>,
      %cst_138 = arith.constant 0.000000e+00 : f32
      %177 = vector.broadcast %cst_138 : f32 to vector<4x2x128xf32>
      %c0_139 = arith.constant 0 : index
      %c0_140 = arith.constant 0 : index
      %c0_141 = arith.constant 0 : index
      %c0_142 = arith.constant 0 : index
      %178 = vector.load %arg6[%c0_139, %c0_140, %c0_141, %c0_142] : memref<1x4x2x128xf32, #tpu.memory_space<vmem>>, vector<1x4x2x128xf32>
      %179 = vector.shape_cast %178 : vector<1x4x2x128xf32> to vector<4x2x128xf32>
      %180 = vector.shape_cast %177 : vector<4x2x128xf32> to vector<1x4x2x128xf32>
      tpu.vector_store %arg6[%c0_139, %c0_140, %c0_141, %c0_142], %180 {strides = array<i32>} : memref<1x4x2x128xf32, #tpu.memory_space<vmem>>, vector<1x4x2x128xf32>,
      %cst_143 = arith.constant 0.000000e+00 : f32
      %181 = vector.broadcast %cst_143 : f32 to vector<4x2x128xf32>
      %c0_144 = arith.constant 0 : index
      %c0_145 = arith.constant 0 : index
      %c0_146 = arith.constant 0 : index
      %c0_147 = arith.constant 0 : index
      %182 = vector.load %arg7[%c0_144, %c0_145, %c0_146, %c0_147] : memref<1x4x2x128xf32, #tpu.memory_space<vmem>>, vector<1x4x2x128xf32>
      %183 = vector.shape_cast %182 : vector<1x4x2x128xf32> to vector<4x2x128xf32>
      %184 = vector.shape_cast %181 : vector<4x2x128xf32> to vector<1x4x2x128xf32>
      tpu.vector_store %arg7[%c0_144, %c0_145, %c0_146, %c0_147], %184 {strides = array<i32>} : memref<1x4x2x128xf32, #tpu.memory_space<vmem>>, vector<1x4x2x128xf32>,
    } else {
    }
    %c1_i32 = arith.constant 1 : i32
    %5 = arith.muli %arg0, %c1_i32 : i32
    %6 = arith.addi %5, %arg2 : i32
    %7 = tpu.iota {dimensions = array<i32: 0>} : vector<2x128xi32>
    %c2_i32 = arith.constant 2 : i32
    %8 = arith.muli %6, %c2_i32 : i32
    %9 = vector.broadcast %8 : i32 to vector<2x128xi32>
    %10 = arith.addi %7, %9 : vector<2x128xi32>
    %11 = tpu.iota {dimensions = array<i32: 1>} : vector<2x128xi32>
    %c128_i32 = arith.constant 128 : i32
    %12 = vector.broadcast %c128_i32 : i32 to vector<2x128xi32>
    %13 = arith.muli %10, %12 : vector<2x128xi32>
    %14 = arith.addi %13, %11 : vector<2x128xi32>
    %c256_i32 = arith.constant 256 : i32
    %15 = vector.broadcast %c256_i32 : i32 to vector<2x128xi32>
    %16 = arith.cmpi slt, %14, %15 : vector<2x128xi32>
    %c0 = arith.constant 0 : index
    %c0_2 = arith.constant 0 : index
    %c0_3 = arith.constant 0 : index
    %17 = vector.load %arg4[%c0, %c0_2, %c0_3] : memref<1x2x128xi32, #tpu.memory_space<vmem>>, vector<1x2x128xi32>
    %18 = vector.shape_cast %17 : vector<1x2x128xi32> to vector<2x128xi32>
    %c-1_i32 = arith.constant -1 : i32
    %19 = vector.broadcast %c-1_i32 : i32 to vector<2x128xi32>
    %20 = arith.cmpi ne, %18, %19 : vector<2x128xi32>
    %21 = arith.andi %16, %20 : vector<2x128xi1>
    %c0_4 = arith.constant 0 : index
    %c0_5 = arith.constant 0 : index
    %c0_6 = arith.constant 0 : index
    %c0_7 = arith.constant 0 : index
    %22 = vector.load %arg3[%c0_4, %c0_5, %c0_6, %c0_7] : memref<1x4x2x128xf32, #tpu.memory_space<vmem>>, vector<1x1x2x128xf32>
    %23 = vector.shape_cast %22 : vector<1x1x2x128xf32> to vector<2x128xf32>
    %cst = arith.constant 0.000000e+00 : f32
    %24 = vector.broadcast %cst : f32 to vector<2x128xf32>
    %25 = arith.select %16, %23, %24 : vector<2x128xi1>, vector<2x128xf32>
    %c0_8 = arith.constant 0 : index
    %c1 = arith.constant 1 : index
    %c0_9 = arith.constant 0 : index
    %c0_10 = arith.constant 0 : index
    %26 = vector.load %arg3[%c0_8, %c1, %c0_9, %c0_10] : memref<1x4x2x128xf32, #tpu.memory_space<vmem>>, vector<1x1x2x128xf32>
    %27 = vector.shape_cast %26 : vector<1x1x2x128xf32> to vector<2x128xf32>
    %cst_11 = arith.constant 0.000000e+00 : f32
    %28 = vector.broadcast %cst_11 : f32 to vector<2x128xf32>
    %29 = arith.select %16, %27, %28 : vector<2x128xi1>, vector<2x128xf32>
    %c0_12 = arith.constant 0 : index
    %c2 = arith.constant 2 : index
    %c0_13 = arith.constant 0 : index
    %c0_14 = arith.constant 0 : index
    %30 = vector.load %arg3[%c0_12, %c2, %c0_13, %c0_14] : memref<1x4x2x128xf32, #tpu.memory_space<vmem>>, vector<1x1x2x128xf32>
    %31 = vector.shape_cast %30 : vector<1x1x2x128xf32> to vector<2x128xf32>
    %cst_15 = arith.constant 0.000000e+00 : f32
    %32 = vector.broadcast %cst_15 : f32 to vector<2x128xf32>
    %33 = arith.select %16, %31, %32 : vector<2x128xi1>, vector<2x128xf32>
    %c0_16 = arith.constant 0 : index
    %c3 = arith.constant 3 : index
    %c0_17 = arith.constant 0 : index
    %c0_18 = arith.constant 0 : index
    %34 = vector.load %arg3[%c0_16, %c3, %c0_17, %c0_18] : memref<1x4x2x128xf32, #tpu.memory_space<vmem>>, vector<1x1x2x128xf32>
    %35 = vector.shape_cast %34 : vector<1x1x2x128xf32> to vector<2x128xf32>
    %cst_19 = arith.constant 0.000000e+00 : f32
    %36 = vector.broadcast %cst_19 : f32 to vector<2x128xf32>
    %37 = arith.select %16, %35, %36 : vector<2x128xi1>, vector<2x128xf32>
    %38 = arith.maximumf %25, %29 : vector<2x128xf32>
    %39 = arith.maximumf %38, %33 : vector<2x128xf32>
    %40 = arith.maximumf %39, %37 : vector<2x128xf32>
    %41 = arith.subf %25, %40 : vector<2x128xf32>
    %42 = math.exp %41 : vector<2x128xf32>
    %43 = arith.subf %29, %40 : vector<2x128xf32>
    %44 = math.exp %43 : vector<2x128xf32>
    %45 = arith.subf %33, %40 : vector<2x128xf32>
    %46 = math.exp %45 : vector<2x128xf32>
    %47 = arith.subf %37, %40 : vector<2x128xf32>
    %48 = math.exp %47 : vector<2x128xf32>
    %49 = arith.addf %42, %44 : vector<2x128xf32>
    %50 = arith.addf %49, %46 : vector<2x128xf32>
    %51 = arith.addf %50, %48 : vector<2x128xf32>
    %52 = tpu.reciprocal %51 {approx = true} : vector<2x128xf32> -> vector<2x128xf32>
    %53 = arith.mulf %51, %52 : vector<2x128xf32>
    %cst_20 = arith.constant 2.000000e+00 : f32
    %54 = vector.broadcast %cst_20 : f32 to vector<2x128xf32>
    %55 = arith.subf %54, %53 : vector<2x128xf32>
    %56 = arith.mulf %52, %55 : vector<2x128xf32>
    %cst_21 = arith.constant 0.000000e+00 : f32
    %57 = vector.broadcast %cst_21 : f32 to vector<2x128xf32>
    %58 = arith.select %16, %56, %57 : vector<2x128xi1>, vector<2x128xf32>
    %59 = math.log %51 : vector<2x128xf32>
    %60 = arith.addf %40, %59 : vector<2x128xf32>
    %c0_i32_22 = arith.constant 0 : i32
    %61 = vector.broadcast %c0_i32_22 : i32 to vector<2x128xi32>
    %62 = arith.cmpi eq, %18, %61 : vector<2x128xi32>
    %63 = arith.andi %21, %62 : vector<2x128xi1>
    %c0_23 = arith.constant 0 : index
    %c0_24 = arith.constant 0 : index
    %c0_25 = arith.constant 0 : index
    %c0_26 = arith.constant 0 : index
    %64 = vector.load %arg5[%c0_23, %c0_24, %c0_25, %c0_26] : memref<1x4x2x128xf32, #tpu.memory_space<vmem>>, vector<1x1x2x128xf32>
    %65 = vector.shape_cast %64 : vector<1x1x2x128xf32> to vector<2x128xf32>
    %66 = arith.mulf %42, %58 : vector<2x128xf32>
    %67 = arith.addf %65, %66 : vector<2x128xf32>
    %c0_27 = arith.constant 0 : index
    %c0_28 = arith.constant 0 : index
    %c0_29 = arith.constant 0 : index
    %c0_30 = arith.constant 0 : index
    %68 = vector.load %arg5[%c0_27, %c0_28, %c0_29, %c0_30] : memref<1x4x2x128xf32, #tpu.memory_space<vmem>>, vector<1x1x2x128xf32>
    %69 = vector.shape_cast %68 : vector<1x1x2x128xf32> to vector<2x128xf32>
    %70 = vector.shape_cast %67 : vector<2x128xf32> to vector<1x1x2x128xf32>
    tpu.vector_store %arg5[%c0_27, %c0_28, %c0_29, %c0_30], %70 {strides = array<i32>} : memref<1x4x2x128xf32, #tpu.memory_space<vmem>>, vector<1x1x2x128xf32>,
    %c0_31 = arith.constant 0 : index
    %c0_32 = arith.constant 0 : index
    %c0_33 = arith.constant 0 : index
    %c0_34 = arith.constant 0 : index
    %71 = vector.load %arg6[%c0_31, %c0_32, %c0_33, %c0_34] : memref<1x4x2x128xf32, #tpu.memory_space<vmem>>, vector<1x1x2x128xf32>
    %72 = vector.shape_cast %71 : vector<1x1x2x128xf32> to vector<2x128xf32>
    %73 = arith.subf %60, %25 : vector<2x128xf32>
    %cst_35 = arith.constant 0.000000e+00 : f32
    %74 = vector.broadcast %cst_35 : f32 to vector<2x128xf32>
    %75 = arith.select %63, %73, %74 : vector<2x128xi1>, vector<2x128xf32>
    %76 = arith.addf %72, %75 : vector<2x128xf32>
    %c0_36 = arith.constant 0 : index
    %c0_37 = arith.constant 0 : index
    %c0_38 = arith.constant 0 : index
    %c0_39 = arith.constant 0 : index
    %77 = vector.load %arg6[%c0_36, %c0_37, %c0_38, %c0_39] : memref<1x4x2x128xf32, #tpu.memory_space<vmem>>, vector<1x1x2x128xf32>
    %78 = vector.shape_cast %77 : vector<1x1x2x128xf32> to vector<2x128xf32>
    %79 = vector.shape_cast %76 : vector<2x128xf32> to vector<1x1x2x128xf32>
    tpu.vector_store %arg6[%c0_36, %c0_37, %c0_38, %c0_39], %79 {strides = array<i32>} : memref<1x4x2x128xf32, #tpu.memory_space<vmem>>, vector<1x1x2x128xf32>,
    %c0_40 = arith.constant 0 : index
    %c0_41 = arith.constant 0 : index
    %c0_42 = arith.constant 0 : index
    %c0_43 = arith.constant 0 : index
    %80 = vector.load %arg7[%c0_40, %c0_41, %c0_42, %c0_43] : memref<1x4x2x128xf32, #tpu.memory_space<vmem>>, vector<1x1x2x128xf32>
    %81 = vector.shape_cast %80 : vector<1x1x2x128xf32> to vector<2x128xf32>
    %cst_44 = arith.constant 1.000000e+00 : f32
    %cst_45 = arith.constant 0.000000e+00 : f32
    %82 = vector.broadcast %cst_44 : f32 to vector<2x128xf32>
    %83 = vector.broadcast %cst_45 : f32 to vector<2x128xf32>
    %84 = arith.select %63, %82, %83 : vector<2x128xi1>, vector<2x128xf32>
    %85 = arith.addf %81, %84 : vector<2x128xf32>
    %c0_46 = arith.constant 0 : index
    %c0_47 = arith.constant 0 : index
    %c0_48 = arith.constant 0 : index
    %c0_49 = arith.constant 0 : index
    %86 = vector.load %arg7[%c0_46, %c0_47, %c0_48, %c0_49] : memref<1x4x2x128xf32, #tpu.memory_space<vmem>>, vector<1x1x2x128xf32>
    %87 = vector.shape_cast %86 : vector<1x1x2x128xf32> to vector<2x128xf32>
    %88 = vector.shape_cast %85 : vector<2x128xf32> to vector<1x1x2x128xf32>
    tpu.vector_store %arg7[%c0_46, %c0_47, %c0_48, %c0_49], %88 {strides = array<i32>} : memref<1x4x2x128xf32, #tpu.memory_space<vmem>>, vector<1x1x2x128xf32>,
    %c1_i32_50 = arith.constant 1 : i32
    %89 = vector.broadcast %c1_i32_50 : i32 to vector<2x128xi32>
    %90 = arith.cmpi eq, %18, %89 : vector<2x128xi32>
    %91 = arith.andi %21, %90 : vector<2x128xi1>
    %c0_51 = arith.constant 0 : index
    %c1_52 = arith.constant 1 : index
    %c0_53 = arith.constant 0 : index
    %c0_54 = arith.constant 0 : index
    %92 = vector.load %arg5[%c0_51, %c1_52, %c0_53, %c0_54] : memref<1x4x2x128xf32, #tpu.memory_space<vmem>>, vector<1x1x2x128xf32>
    %93 = vector.shape_cast %92 : vector<1x1x2x128xf32> to vector<2x128xf32>
    %94 = arith.mulf %44, %58 : vector<2x128xf32>
    %95 = arith.addf %93, %94 : vector<2x128xf32>
    %c0_55 = arith.constant 0 : index
    %c1_56 = arith.constant 1 : index
    %c0_57 = arith.constant 0 : index
    %c0_58 = arith.constant 0 : index
    %96 = vector.load %arg5[%c0_55, %c1_56, %c0_57, %c0_58] : memref<1x4x2x128xf32, #tpu.memory_space<vmem>>, vector<1x1x2x128xf32>
    %97 = vector.shape_cast %96 : vector<1x1x2x128xf32> to vector<2x128xf32>
    %98 = vector.shape_cast %95 : vector<2x128xf32> to vector<1x1x2x128xf32>
    tpu.vector_store %arg5[%c0_55, %c1_56, %c0_57, %c0_58], %98 {strides = array<i32>} : memref<1x4x2x128xf32, #tpu.memory_space<vmem>>, vector<1x1x2x128xf32>,
    %c0_59 = arith.constant 0 : index
    %c1_60 = arith.constant 1 : index
    %c0_61 = arith.constant 0 : index
    %c0_62 = arith.constant 0 : index
    %99 = vector.load %arg6[%c0_59, %c1_60, %c0_61, %c0_62] : memref<1x4x2x128xf32, #tpu.memory_space<vmem>>, vector<1x1x2x128xf32>
    %100 = vector.shape_cast %99 : vector<1x1x2x128xf32> to vector<2x128xf32>
    %101 = arith.subf %60, %29 : vector<2x128xf32>
    %cst_63 = arith.constant 0.000000e+00 : f32
    %102 = vector.broadcast %cst_63 : f32 to vector<2x128xf32>
    %103 = arith.select %91, %101, %102 : vector<2x128xi1>, vector<2x128xf32>
    %104 = arith.addf %100, %103 : vector<2x128xf32>
    %c0_64 = arith.constant 0 : index
    %c1_65 = arith.constant 1 : index
    %c0_66 = arith.constant 0 : index
    %c0_67 = arith.constant 0 : index
    %105 = vector.load %arg6[%c0_64, %c1_65, %c0_66, %c0_67] : memref<1x4x2x128xf32, #tpu.memory_space<vmem>>, vector<1x1x2x128xf32>
    %106 = vector.shape_cast %105 : vector<1x1x2x128xf32> to vector<2x128xf32>
    %107 = vector.shape_cast %104 : vector<2x128xf32> to vector<1x1x2x128xf32>
    tpu.vector_store %arg6[%c0_64, %c1_65, %c0_66, %c0_67], %107 {strides = array<i32>} : memref<1x4x2x128xf32, #tpu.memory_space<vmem>>, vector<1x1x2x128xf32>,
    %c0_68 = arith.constant 0 : index
    %c1_69 = arith.constant 1 : index
    %c0_70 = arith.constant 0 : index
    %c0_71 = arith.constant 0 : index
    %108 = vector.load %arg7[%c0_68, %c1_69, %c0_70, %c0_71] : memref<1x4x2x128xf32, #tpu.memory_space<vmem>>, vector<1x1x2x128xf32>
    %109 = vector.shape_cast %108 : vector<1x1x2x128xf32> to vector<2x128xf32>
    %cst_72 = arith.constant 1.000000e+00 : f32
    %cst_73 = arith.constant 0.000000e+00 : f32
    %110 = vector.broadcast %cst_72 : f32 to vector<2x128xf32>
    %111 = vector.broadcast %cst_73 : f32 to vector<2x128xf32>
    %112 = arith.select %91, %110, %111 : vector<2x128xi1>, vector<2x128xf32>
    %113 = arith.addf %109, %112 : vector<2x128xf32>
    %c0_74 = arith.constant 0 : index
    %c1_75 = arith.constant 1 : index
    %c0_76 = arith.constant 0 : index
    %c0_77 = arith.constant 0 : index
    %114 = vector.load %arg7[%c0_74, %c1_75, %c0_76, %c0_77] : memref<1x4x2x128xf32, #tpu.memory_space<vmem>>, vector<1x1x2x128xf32>
    %115 = vector.shape_cast %114 : vector<1x1x2x128xf32> to vector<2x128xf32>
    %116 = vector.shape_cast %113 : vector<2x128xf32> to vector<1x1x2x128xf32>
    tpu.vector_store %arg7[%c0_74, %c1_75, %c0_76, %c0_77], %116 {strides = array<i32>} : memref<1x4x2x128xf32, #tpu.memory_space<vmem>>, vector<1x1x2x128xf32>,
    %c2_i32_78 = arith.constant 2 : i32
    %117 = vector.broadcast %c2_i32_78 : i32 to vector<2x128xi32>
    %118 = arith.cmpi eq, %18, %117 : vector<2x128xi32>
    %119 = arith.andi %21, %118 : vector<2x128xi1>
    %c0_79 = arith.constant 0 : index
    %c2_80 = arith.constant 2 : index
    %c0_81 = arith.constant 0 : index
    %c0_82 = arith.constant 0 : index
    %120 = vector.load %arg5[%c0_79, %c2_80, %c0_81, %c0_82] : memref<1x4x2x128xf32, #tpu.memory_space<vmem>>, vector<1x1x2x128xf32>
    %121 = vector.shape_cast %120 : vector<1x1x2x128xf32> to vector<2x128xf32>
    %122 = arith.mulf %46, %58 : vector<2x128xf32>
    %123 = arith.addf %121, %122 : vector<2x128xf32>
    %c0_83 = arith.constant 0 : index
    %c2_84 = arith.constant 2 : index
    %c0_85 = arith.constant 0 : index
    %c0_86 = arith.constant 0 : index
    %124 = vector.load %arg5[%c0_83, %c2_84, %c0_85, %c0_86] : memref<1x4x2x128xf32, #tpu.memory_space<vmem>>, vector<1x1x2x128xf32>
    %125 = vector.shape_cast %124 : vector<1x1x2x128xf32> to vector<2x128xf32>
    %126 = vector.shape_cast %123 : vector<2x128xf32> to vector<1x1x2x128xf32>
    tpu.vector_store %arg5[%c0_83, %c2_84, %c0_85, %c0_86], %126 {strides = array<i32>} : memref<1x4x2x128xf32, #tpu.memory_space<vmem>>, vector<1x1x2x128xf32>,
    %c0_87 = arith.constant 0 : index
    %c2_88 = arith.constant 2 : index
    %c0_89 = arith.constant 0 : index
    %c0_90 = arith.constant 0 : index
    %127 = vector.load %arg6[%c0_87, %c2_88, %c0_89, %c0_90] : memref<1x4x2x128xf32, #tpu.memory_space<vmem>>, vector<1x1x2x128xf32>
    %128 = vector.shape_cast %127 : vector<1x1x2x128xf32> to vector<2x128xf32>
    %129 = arith.subf %60, %33 : vector<2x128xf32>
    %cst_91 = arith.constant 0.000000e+00 : f32
    %130 = vector.broadcast %cst_91 : f32 to vector<2x128xf32>
    %131 = arith.select %119, %129, %130 : vector<2x128xi1>, vector<2x128xf32>
    %132 = arith.addf %128, %131 : vector<2x128xf32>
    %c0_92 = arith.constant 0 : index
    %c2_93 = arith.constant 2 : index
    %c0_94 = arith.constant 0 : index
    %c0_95 = arith.constant 0 : index
    %133 = vector.load %arg6[%c0_92, %c2_93, %c0_94, %c0_95] : memref<1x4x2x128xf32, #tpu.memory_space<vmem>>, vector<1x1x2x128xf32>
    %134 = vector.shape_cast %133 : vector<1x1x2x128xf32> to vector<2x128xf32>
    %135 = vector.shape_cast %132 : vector<2x128xf32> to vector<1x1x2x128xf32>
    tpu.vector_store %arg6[%c0_92, %c2_93, %c0_94, %c0_95], %135 {strides = array<i32>} : memref<1x4x2x128xf32, #tpu.memory_space<vmem>>, vector<1x1x2x128xf32>,
    %c0_96 = arith.constant 0 : index
    %c2_97 = arith.constant 2 : index
    %c0_98 = arith.constant 0 : index
    %c0_99 = arith.constant 0 : index
    %136 = vector.load %arg7[%c0_96, %c2_97, %c0_98, %c0_99] : memref<1x4x2x128xf32, #tpu.memory_space<vmem>>, vector<1x1x2x128xf32>
    %137 = vector.shape_cast %136 : vector<1x1x2x128xf32> to vector<2x128xf32>
    %cst_100 = arith.constant 1.000000e+00 : f32
    %cst_101 = arith.constant 0.000000e+00 : f32
    %138 = vector.broadcast %cst_100 : f32 to vector<2x128xf32>
    %139 = vector.broadcast %cst_101 : f32 to vector<2x128xf32>
    %140 = arith.select %119, %138, %139 : vector<2x128xi1>, vector<2x128xf32>
    %141 = arith.addf %137, %140 : vector<2x128xf32>
    %c0_102 = arith.constant 0 : index
    %c2_103 = arith.constant 2 : index
    %c0_104 = arith.constant 0 : index
    %c0_105 = arith.constant 0 : index
    %142 = vector.load %arg7[%c0_102, %c2_103, %c0_104, %c0_105] : memref<1x4x2x128xf32, #tpu.memory_space<vmem>>, vector<1x1x2x128xf32>
    %143 = vector.shape_cast %142 : vector<1x1x2x128xf32> to vector<2x128xf32>
    %144 = vector.shape_cast %141 : vector<2x128xf32> to vector<1x1x2x128xf32>
    tpu.vector_store %arg7[%c0_102, %c2_103, %c0_104, %c0_105], %144 {strides = array<i32>} : memref<1x4x2x128xf32, #tpu.memory_space<vmem>>, vector<1x1x2x128xf32>,
    %c3_i32 = arith.constant 3 : i32
    %145 = vector.broadcast %c3_i32 : i32 to vector<2x128xi32>
    %146 = arith.cmpi eq, %18, %145 : vector<2x128xi32>
    %147 = arith.andi %21, %146 : vector<2x128xi1>
    %c0_106 = arith.constant 0 : index
    %c3_107 = arith.constant 3 : index
    %c0_108 = arith.constant 0 : index
    %c0_109 = arith.constant 0 : index
    %148 = vector.load %arg5[%c0_106, %c3_107, %c0_108, %c0_109] : memref<1x4x2x128xf32, #tpu.memory_space<vmem>>, vector<1x1x2x128xf32>
    %149 = vector.shape_cast %148 : vector<1x1x2x128xf32> to vector<2x128xf32>
    %150 = arith.mulf %48, %58 : vector<2x128xf32>
    %151 = arith.addf %149, %150 : vector<2x128xf32>
    %c0_110 = arith.constant 0 : index
    %c3_111 = arith.constant 3 : index
    %c0_112 = arith.constant 0 : index
    %c0_113 = arith.constant 0 : index
    %152 = vector.load %arg5[%c0_110, %c3_111, %c0_112, %c0_113] : memref<1x4x2x128xf32, #tpu.memory_space<vmem>>, vector<1x1x2x128xf32>
    %153 = vector.shape_cast %152 : vector<1x1x2x128xf32> to vector<2x128xf32>
    %154 = vector.shape_cast %151 : vector<2x128xf32> to vector<1x1x2x128xf32>
    tpu.vector_store %arg5[%c0_110, %c3_111, %c0_112, %c0_113], %154 {strides = array<i32>} : memref<1x4x2x128xf32, #tpu.memory_space<vmem>>, vector<1x1x2x128xf32>,
    %c0_114 = arith.constant 0 : index
    %c3_115 = arith.constant 3 : index
    %c0_116 = arith.constant 0 : index
    %c0_117 = arith.constant 0 : index
    %155 = vector.load %arg6[%c0_114, %c3_115, %c0_116, %c0_117] : memref<1x4x2x128xf32, #tpu.memory_space<vmem>>, vector<1x1x2x128xf32>
    %156 = vector.shape_cast %155 : vector<1x1x2x128xf32> to vector<2x128xf32>
    %157 = arith.subf %60, %37 : vector<2x128xf32>
    %cst_118 = arith.constant 0.000000e+00 : f32
    %158 = vector.broadcast %cst_118 : f32 to vector<2x128xf32>
    %159 = arith.select %147, %157, %158 : vector<2x128xi1>, vector<2x128xf32>
    %160 = arith.addf %156, %159 : vector<2x128xf32>
    %c0_119 = arith.constant 0 : index
    %c3_120 = arith.constant 3 : index
    %c0_121 = arith.constant 0 : index
    %c0_122 = arith.constant 0 : index
    %161 = vector.load %arg6[%c0_119, %c3_120, %c0_121, %c0_122] : memref<1x4x2x128xf32, #tpu.memory_space<vmem>>, vector<1x1x2x128xf32>
    %162 = vector.shape_cast %161 : vector<1x1x2x128xf32> to vector<2x128xf32>
    %163 = vector.shape_cast %160 : vector<2x128xf32> to vector<1x1x2x128xf32>
    tpu.vector_store %arg6[%c0_119, %c3_120, %c0_121, %c0_122], %163 {strides = array<i32>} : memref<1x4x2x128xf32, #tpu.memory_space<vmem>>, vector<1x1x2x128xf32>,
    %c0_123 = arith.constant 0 : index
    %c3_124 = arith.constant 3 : index
    %c0_125 = arith.constant 0 : index
    %c0_126 = arith.constant 0 : index
    %164 = vector.load %arg7[%c0_123, %c3_124, %c0_125, %c0_126] : memref<1x4x2x128xf32, #tpu.memory_space<vmem>>, vector<1x1x2x128xf32>
    %165 = vector.shape_cast %164 : vector<1x1x2x128xf32> to vector<2x128xf32>
    %cst_127 = arith.constant 1.000000e+00 : f32
    %cst_128 = arith.constant 0.000000e+00 : f32
    %166 = vector.broadcast %cst_127 : f32 to vector<2x128xf32>
    %167 = vector.broadcast %cst_128 : f32 to vector<2x128xf32>
    %168 = arith.select %147, %166, %167 : vector<2x128xi1>, vector<2x128xf32>
    %169 = arith.addf %165, %168 : vector<2x128xf32>
    %c0_129 = arith.constant 0 : index
    %c3_130 = arith.constant 3 : index
    %c0_131 = arith.constant 0 : index
    %c0_132 = arith.constant 0 : index
    %170 = vector.load %arg7[%c0_129, %c3_130, %c0_131, %c0_132] : memref<1x4x2x128xf32, #tpu.memory_space<vmem>>, vector<1x1x2x128xf32>
    %171 = vector.shape_cast %170 : vector<1x1x2x128xf32> to vector<2x128xf32>
    %172 = vector.shape_cast %169 : vector<2x128xf32> to vector<1x1x2x128xf32>
    tpu.vector_store %arg7[%c0_129, %c3_130, %c0_131, %c0_132], %172 {strides = array<i32>} : memref<1x4x2x128xf32, #tpu.memory_space<vmem>>, vector<1x1x2x128xf32>,
    return
  }
  func.func @transform_0(%arg0: i32, %arg1: i32, %arg2: i32) -> (i32, i32, i32, i32) {
    %c1_i32 = arith.constant 1 : i32
    %0 = arith.muli %arg0, %c1_i32 : i32
    %1 = arith.addi %0, %arg2 : i32
    %c0_i32 = arith.constant 0 : i32
    %2 = arith.minsi %1, %c0_i32 : i32
    %c0_i32_0 = arith.constant 0 : i32
    %c0_i32_1 = arith.constant 0 : i32
    %c0_i32_2 = arith.constant 0 : i32
    return %arg1, %c0_i32_0, %2, %c0_i32_1 : i32, i32, i32, i32
  }
  func.func @transform_1(%arg0: i32, %arg1: i32, %arg2: i32) -> (i32, i32, i32) {
    %c1_i32 = arith.constant 1 : i32
    %0 = arith.muli %arg0, %c1_i32 : i32
    %1 = arith.addi %0, %arg2 : i32
    %c0_i32 = arith.constant 0 : i32
    %2 = arith.minsi %1, %c0_i32 : i32
    %c0_i32_0 = arith.constant 0 : i32
    %c0_i32_1 = arith.constant 0 : i32
    return %arg1, %2, %c0_i32_0 : i32, i32, i32
  }
  func.func @transform_2(%arg0: i32, %arg1: i32, %arg2: i32) -> (i32, i32, i32, i32) {
    %c0_i32 = arith.constant 0 : i32
    %c0_i32_0 = arith.constant 0 : i32
    %c0_i32_1 = arith.constant 0 : i32
    %c0_i32_2 = arith.constant 0 : i32
    return %arg0, %c0_i32, %c0_i32_0, %c0_i32_1 : i32, i32, i32, i32
  }
  func.func @transform_3(%arg0: i32, %arg1: i32, %arg2: i32) -> (i32, i32, i32, i32) {
    %c0_i32 = arith.constant 0 : i32
    %c0_i32_0 = arith.constant 0 : i32
    %c0_i32_1 = arith.constant 0 : i32
    %c0_i32_2 = arith.constant 0 : i32
    return %arg0, %c0_i32, %c0_i32_0, %c0_i32_1 : i32, i32, i32, i32
  }
  func.func @transform_4(%arg0: i32, %arg1: i32, %arg2: i32) -> (i32, i32, i32, i32) {
    %c0_i32 = arith.constant 0 : i32
    %c0_i32_0 = arith.constant 0 : i32
    %c0_i32_1 = arith.constant 0 : i32
    %c0_i32_2 = arith.constant 0 : i32
    return %arg0, %c0_i32, %c0_i32_0, %c0_i32_1 : i32, i32, i32, i32
  }
}

</mosaic_0001>

<bundles_post_ra>
// kernel: tpu_custom_call.1
= control target key start
LH: loop header
LB: loop body
LE: loop exit
PB: predicated region body
PF: predicated region fallthrough
CT: control target
= control target key end

     0   :  { %10 = vsyncpa [#allocation3], 0  ;;  %s1215_s0 = inlined_call_operand.hbm [shape: f32[2,4,2,128], index: 0, kind: input, shape index: {}]   ;;  %s1216_s1 = inlined_call_operand.hbm [shape: s32[2,2,128], index: 1, kind: input, shape index: {}]   ;;  %s1217_s2 = inlined_call_operand.hbm [shape: f32[1,4,2,128], index: 2, kind: output, shape index: {0}]   ;;  %s1218_s3 = inlined_call_operand.hbm [shape: f32[1,4,2,128], index: 3, kind: output, shape index: {1}]   ;;  %s1219_s4 = inlined_call_operand.hbm [shape: f32[1,4,2,128], index: 4, kind: output, shape index: {2}]  }
   0x1   :  { %12 = vsyncpa [#allocation3 + $0x1], 0 }
   0x2   :  { %13 = vsyncpa [#allocation6], 0 }
   0x3   :  { %15 = vsyncpa [#allocation6 + $0x1], 0 }
   0x4   :  { %16 = vsyncpa [#allocation4], 0 }
   0x5   :  { %17 = vsyncpa [#allocation9], 0  ;;  %s950_s15 = smov 0   ;;  %s952_s16 = smov 0  }
   0x6   :  { %s954_s17 = smov 0   ;;  %s956_s18 = smov 0  }
   0x7   :  { %s958_s19 = smov 0   ;;  %s960_s20 = smov 0  }
   0x8 LB: > { %s598_s21 = sadd.s32 4294967295, %s912_s20   ;;  %s38_s22 = sadd.s32 1, %s908_s19  ;;  %s912_s20 = sphi %s960_s20, %s23_s20   ;;  %s908_s19 = sphi %s958_s19, %s1239_s19   ;;  %s904_s18 = sphi %s956_s18, %s1238_s18   ;;  %s900_s17 = sphi %s954_s17, %s1237_s17   ;;  %s896_s16 = sphi %s952_s16, %s1236_s16   ;;  %s892_s15 = sphi %s950_s15, %s1235_s15  }
   0x9   : > { %p40_p0 = scmp.ge.s32.totalorder %s38_s22, 2  ;;  %s57_s23 = sadd.s32 1, %s900_s17 }
   0xa   : > { %p64_p1 = scmp.ne.s32.totalorder %s900_s17, %s896_s16  ;;  %p65_p2 = scmp.eq.s32.totalorder %s912_s20, 0 }
   0xb   : > { %s1241_s22 = smov (%p40_p0, %s38_s22), 0  ;;  %p70_p4 = scmp.ne.s32.totalorder %s896_s16, %s892_s15 }
   0xc   : > { %p986_p3 = por %p65_p2, %p64_p1  ;;  %s52_s25 = ssub.s32 %s908_s19, %s1241_s22 }
   0xd   : > { %p71_p5 = scmp.eq.s32.totalorder %s598_s21, 0  ;;  %p55_p6 = scmp.eq.s32.totalorder %s52_s25, 0 }
   0xe   : > { %p646_p8 = scmp.lt.s32.totalorder %s912_s20, 2  ;;  %s1004_s28 = sand.u32 1, %s900_s17  }
   0xf   : > { %p995_p7 = por %p71_p5, %p70_p4  ;;  %s621_s29 = sshll.u32 %s908_s19, 7 }
  0x10   : > { %s1001_s27 = scalar_select %p55_p6, %s900_s17, %s57_s23  }
  0x11   : > { %s601_s30 = sshll.u32 %s1004_s28, 3  ;;  %s220_s7 = scalar_lea.hbm %s1215_s0, %s621_s29 }
  0x12   : > { %s210_s8 = scalar_lea.vmem [#allocation2], %s601_s30  ;;  %p1013_p9 = pnand %p646_p8, %p986_p3 }
  0x13   : > { %s221_s9 = sshll.u32 %s210_s8, 4  ;;  %s207_s11 = scalar_lea.sflag [#allocation3], %s1004_s28  ;;  %s222_s9 = int_to_ptr.vmem [resolvable:$true] %s221_s9 }
  0x14   : > { %p724_p10 = pneg %p1013_p9  ;;  %s735_s12 = scalar_lea.vmem %s222_s9, 128 }
  0x15   : > { %p736_p11 = scmp.ne.s32.totalorder %s222_s9, %s735_s12  ;;  %s914_s13 = smov [#allocation2]  }
  0x16   : > { %s740_s14 = sshll.u32 %s914_s13, 4  ;;  %s741_s14 = int_to_ptr.vmem [resolvable:$false] %s740_s14 }
  0x17   : > { %p738_p12 = pnand %p736_p11, %p724_p10  ;;  %s742_s15 = scalar_lea.vmem %s741_s14, 256 }
  0x18   : > { %p743_p0 = scmp.lt.s32.totalorder %s222_s9, %s741_s14  ;;  %p744_p1 = scmp.lt.s32.totalorder %s742_s15, %s735_s12 }
  0x19   : > { %p739_p13 = pneg %p738_p12 }
  0x1a   : > { %p745_p2 = por %p744_p1, %p743_p0 }
  0x1c   : > { %p746_p3 = pnand %p745_p2, %p739_p13 }
  0x1e   : > { %749 = shalt.err (!%p746_p3)
}
  0x1f   : > { %s915_s23 = smov 32   ;;  %s916_s24 = smov 2  }
  0x20   : > { %642 = dma.hbm_to_vmem [thread:$0]  (!%p1013_p9), %s220_s7, 128, %s222_s9, %s207_s11, %s915_s23, %s915_s23, %s916_s24  }
  0x21   : > { %p606_p4 = scmp.ge.s32.totalorder %s912_s20, 1  ;;  %p251_p5 = scmp.lt.s32.totalorder %s912_s20, 3 }
  0x22   : > { %s604_s25 = sshll.u32 %s1004_s28, 1  ;;  %s605_s30 = sshll.u32 %s908_s19, 5 }
  0x23   : > { %p1028_p6 = pnand %p606_p4, %p251_p5  ;;  %s235_s5 = scalar_lea.vmem [#allocation5], %s604_s25 }
  0x24   : > { %s246_s6 = sshll.u32 %s235_s5, 4  ;;  %s244_s13 = scalar_lea.hbm %s1216_s1, %s605_s30  ;;  %s247_s6 = int_to_ptr.vmem [resolvable:$true] %s246_s6 }
  0x25   : > { %s232_s14 = scalar_lea.sflag [#allocation6], %s1004_s28  ;;  %s763_s15 = scalar_lea.vmem %s247_s6, 32 }
  0x26   : > { %p764_p8 = scmp.ne.s32.totalorder %s247_s6, %s763_s15  ;;  %s917_s7 = smov [#allocation5]  }
  0x27   : > { %s768_s9 = sshll.u32 %s917_s7, 4  ;;  %s769_s9 = int_to_ptr.vmem [resolvable:$false] %s768_s9 }
  0x28   : > { %p766_p11 = pnand %p764_p8, %p724_p10  ;;  %s770_s11 = scalar_lea.vmem %s769_s9, 64 }
  0x29   : > { %p771_p13 = scmp.lt.s32.totalorder %s247_s6, %s769_s9  ;;  %p772_p0 = scmp.lt.s32.totalorder %s770_s11, %s763_s15 }
  0x2a   : > { %p767_p12 = pneg %p766_p11 }
  0x2b   : > { %p773_p1 = por %p772_p0, %p771_p13 }
  0x2d   : > { %p774_p2 = pnand %p773_p1, %p767_p12 }
  0x2f   : > { %777 = shalt.err (!%p774_p2)
}
  0x30   : > { %645 = dma.hbm_to_vmem [thread:$0]  (!%p1013_p9), %s244_s13, 32, %s247_s6, %s232_s14  }
  0x31   : > { %255 = sbr.rel (%p1028_p6) target bundleno = 161 (0xa1), region = 28  ;;  %s257_s28 = sand.u32 (!%p1028_p6), 1, %s896_s16  }
  0x32   : > { %s607_s23 = sshll.u32 (!%p1028_p6), %s257_s28, 3  ;;  %s258_s24 = scalar_lea.sflag (!%p1028_p6), [#allocation3], %s257_s28 }
  0x33   : > { %s1045_s25 = scalar_lea.vmem (!%p1028_p6), [#allocation2], %s607_s23 }
  0x36   : > { %875 = dma.done.wait (%p995_p7), %s258_s24, 128  }
  0x37   : > { %877 = vsyncadd (%p995_p7), %s258_s24, 4294967168  ;;  %s608_s30 = sshll.u32 %s257_s28, 1  ;;  %s267_s5 = scalar_lea.sflag [#allocation6], %s257_s28 }
  0x38   : > { %s270_s10 = scalar_lea.vmem [#allocation5], %s608_s30 }
  0x39   : > { %879 = dma.done.wait (%p995_p7), %s267_s5, 32  }
  0x3a   : > { %881 = vsyncadd (%p995_p7), %s267_s5, 4294967264  ;;  %p301_p9 = scmp.eq.s32.totalorder %s904_s18, 0 }
  0x3b   : > { %v918_v0 = vmov (%p301_p9), 0.0  }
  0x3c   : > { %306 = sbr.rel (!%p301_p9) target bundleno = 66 (0x42), region = 40  ;;  %307 = vst [vmem:[#allocation7] sm:$0x3] (%p301_p9), %v918_v0  ;;  %308 = vst [vmem:[#allocation7 + $0x2] sm:$0x3] (%p301_p9), %v918_v0 }
  0x3d   : > { %309 = vst [vmem:[#allocation7 + $0x4] sm:$0x3] (%p301_p9), %v918_v0  ;;  %310 = vst [vmem:[#allocation7 + $0x6] sm:$0x3] (%p301_p9), %v918_v0 }
  0x3e   : > { %311 = vst [vmem:[#allocation8] sm:$0x3] (%p301_p9), %v918_v0  ;;  %312 = vst [vmem:[#allocation8 + $0x2] sm:$0x3] (%p301_p9), %v918_v0 }
  0x3f   : > { %313 = vst [vmem:[#allocation8 + $0x4] sm:$0x3] (%p301_p9), %v918_v0  ;;  %314 = vst [vmem:[#allocation8 + $0x6] sm:$0x3] (%p301_p9), %v918_v0 }
  0x40   : > { %315 = vst [vmem:[#allocation10] sm:$0x3] (%p301_p9), %v918_v0  ;;  %316 = vst [vmem:[#allocation10 + $0x2] sm:$0x3] (%p301_p9), %v918_v0 }
  0x41   : > { %317 = vst [vmem:[#allocation10 + $0x4] sm:$0x3] %v918_v0  ;;  %318 = vst [vmem:[#allocation10 + $0x6] sm:$0x3] %v918_v0 }
  0x42 PF: > { %v320_v1 = vlaneseq  ;;  %v330_v4 = vld [vmem:[%s270_s10] sm:$0x3]  ;;  %v333_v6 = vld [vmem:[%s1045_s25] sm:$0x3]  ;;  %v610_v8 = vld [vmem:[%s1045_s25 + $0x2] sm:$0x3] }
  0x43   : > { %vm331_vm0 = vcmp.ne.s32.totalorder %v330_v4, 4294967295  ;;  %v611_v9 = vld [vmem:[%s1045_s25 + $0x4] sm:$0x3]  ;;  %vm370_vm1 = vcmp.eq.s32.totalorder %v330_v4, 0  ;;  %v612_v10 = vld [vmem:[%s1045_s25 + $0x6] sm:$0x3] }
  0x44   : > { %v321_v2 = vshrl.u32 %v320_v1, 7  ;;  %v326_v3 = vand.u32 127, %v320_v1  ;;  %vm385_vm3 = vcmp.eq.s32.totalorder %v330_v4, 1  ;;  %vm403_vm5 = vcmp.eq.s32.totalorder %v330_v4, 2  ;;  %s920_s18 = smov [#allocation8]   ;;  %p1131_p7 = scmp.eq.s32.totalorder %s598_s21, 1 }
  0x45   : > { %vm421_vm7 = vcmp.eq.s32.totalorder %v330_v4, 3  ;;  %v919_v21 = vmov 0.0   ;;  %s464_s26 = sshll.u32 %s920_s18, 4  ;;  %s921_s6 = smov [#allocation10]   ;;  %v372_v11 = vld [vmem:[#allocation7] sm:$0x3]  ;;  %s465_s26 = int_to_ptr.vmem [resolvable:$true] %s464_s26 }
  0x46   : > { %v327_v5 = vmul.u32 128, %v321_v2  ;;  %v376_v56 = vld [vmem:[#allocation8] sm:$0x3]  ;;  %v393_v57 = vld [vmem:[#allocation8 + $0x2] sm:$0x3]  ;;  %s480_s8 = sshll.u32 %s921_s6, 4  ;;  %p785_p5 = scmp.lt.s32.totalorder %s465_s26, %s465_s26  ;;  %s1145_s8 = int_to_ptr.vmem [resolvable:$true] %s480_s8 }
  0x47   : > { %v411_v61 = vld [vmem:[#allocation8 + $0x4] sm:$0x3]  ;;  %v429_v63 = vld [vmem:[#allocation8 + $0x6] sm:$0x3]  ;;  %s922_s12 = smov [#allocation7]   ;;  %s778_s21 = scalar_lea.vmem %s465_s26, 128 }
  0x48   : > { %v1057_v7 = vadd.s32 %v327_v5, %v326_v3  ;;  %v381_v15 = vld [vmem:[#allocation10] sm:$0x3]  ;;  %v399_v18 = vld [vmem:[#allocation10 + $0x2] sm:$0x3]  ;;  %v417_v23 = vld [vmem:[#allocation10 + $0x4] sm:$0x3]  ;;  %p779_p10 = scmp.ne.s32.totalorder %s465_s26, %s778_s21  ;;  %p786_p6 = scmp.lt.s32.totalorder %s778_s21, %s778_s21 }
  0x49   : > { %v435_v28 = vld [vmem:[#allocation10 + $0x6] sm:$0x3]  ;;  %s448_s13 = sshll.u32 %s922_s12, 4  ;;  %s1147_s13 = int_to_ptr.vmem [resolvable:$true] %s448_s13 }
  0x4a   : > { %vm329_vm2 = vcmp.lt.s32.totalorder %v1057_v7, 256  ;;  %p780_p3 = pnand %p779_p10, %p1131_p7  ;;  %p787_p8 = por %p786_p6, %p785_p5 }
  0x4b   : > { %vm1065_vm4 = vmand %vm329_vm2, %vm331_vm0  ;;  %v1071_v12 = vsel %vm329_vm2, %v333_v6, 0.0  ;;  %v1075_v13 = vsel %vm329_vm2, %v610_v8, 0.0  ;;  %v1079_v14 = vsel %vm329_vm2, %v611_v9, 0.0  ;;  %v1091_v19 = vsel %vm329_vm2, %v612_v10, 0.0 }
  0x4c   : > { %v344_v16 = vmax.f32 %v1071_v12, %v1075_v13  ;;  %vm1085_vm6 = vmand %vm1065_vm4, %vm370_vm1  ;;  %p781_p4 = pneg %p780_p3 }
  0x4d   : > { %vm1095_vm8 = vmand %vm1065_vm4, %vm385_vm3  ;;  %v382_v22 = vsel %vm1085_vm6, 1.0, %v919_v21 }
  0x4e   : > { %v345_v24 = vmax.f32 %v344_v16, %v1079_v14  ;;  %vm1104_vm9 = vmand %vm1065_vm4, %vm403_vm5  ;;  %v383_v26 = vadd.f32 %v382_v22, %v381_v15  ;;  %v400_v27 = vsel %vm1095_vm8, 1.0, %v919_v21  ;;  %v424_v15 = vld [vmem:[#allocation7 + $0x6] sm:$0x3]  ;;  %p788_p11 = pnand %p787_p8, %p781_p4 }
  0x4f   : > { %vm1112_vm10 = vmand %vm1065_vm4, %vm421_vm7  ;;  %v401_v30 = vadd.f32 %v400_v27, %v399_v18  ;;  %v418_v31 = vsel %vm1104_vm9, 1.0, %v919_v21 }
  0x50   : > { %v346_v32 = vmax.f32 %v345_v24, %v1091_v19  ;;  %384 = vst [vmem:[#allocation10] sm:$0x3] %v383_v26  ;;  %v419_v33 = vadd.f32 %v418_v31, %v417_v23  ;;  %v436_v34 = vsel %vm1112_vm10, 1.0, %v919_v21 }
  0x51   : > { %402 = vst [vmem:[#allocation10 + $0x2] sm:$0x3] %v401_v30  ;;  %v437_v35 = vadd.f32 %v436_v34, %v435_v28 }
  0x52   : > { %v347_v36 = vsub.f32 %v1071_v12, %v346_v32  ;;  %v350_v37 = vsub.f32 %v1075_v13, %v346_v32  ;;  %v353_v38 = vsub.f32 %v1079_v14, %v346_v32  ;;  %v356_v39 = vsub.f32 %v1091_v19, %v346_v32  ;;  %420 = vst [vmem:[#allocation10 + $0x4] sm:$0x3] %v419_v33 }
  0x53   : > { %438 = vst [vmem:[#allocation10 + $0x6] sm:$0x3] %v437_v35 }
  0x54   : > { %v348_v40 = vmul.f32 1.442695, %v347_v36  ;;  %v351_v41 = vmul.f32 1.442695, %v350_v37  ;;  %v354_v42 = vmul.f32 1.442695, %v353_v38 }
  0x55   : > { %v357_v43 = vmul.f32 1.442695, %v356_v39 }
  0x56   : > { %710 = vpow2.f32 %v348_v40 }
  0x57   : > { %712 = vpow2.f32 %v351_v41 }
  0x58   : > { %714 = vpow2.f32 %v354_v42 }
  0x59   : > { %716 = vpow2.f32 %v357_v43 }
  0x63   : > { %v711_v44 = vpop.eup %710 }
  0x64   : > { %v713_v45 = vpop.eup %712 }
  0x65   : > { %v715_v46 = vpop.eup %714  ;;  %v359_v47 = vadd.f32 %v713_v45, %v711_v44 }
  0x66   : > { %v717_v48 = vpop.eup %716 }
  0x67   : > { %v360_v49 = vadd.f32 %v715_v46, %v359_v47 }
  0x69   : > { %v361_v50 = vadd.f32 %v717_v48, %v360_v49 }
  0x6b   : > { %718 = vlog2.f32 %v361_v50 }
  0x6c   : > { %720 = vrcp.f32 %v361_v50 }
  0x78   : > { %v719_v51 = vpop.eup %718 }
  0x79   : > { %v721_v52 = vpop.eup %720  ;;  %v368_v53 = vmul.f32 0.6931472, %v719_v51 }
  0x7a   : > { %v363_v54 = vmul.f32 %v721_v52, %v361_v50 }
  0x7b   : > { %v369_v55 = vadd.f32 %v368_v53, %v346_v32 }
  0x7c   : > { %v364_v58 = vsub.f32 2.0, %v363_v54 }
  0x7d   : > { %v377_v59 = vsub.f32 %v369_v55, %v1071_v12  ;;  %v394_v60 = vsub.f32 %v369_v55, %v1075_v13  ;;  %v412_v62 = vsub.f32 %v369_v55, %v1079_v14  ;;  %v430_v0 = vsub.f32 %v369_v55, %v1091_v19  ;;  %v388_v12 = vld [vmem:[#allocation7 + $0x2] sm:$0x3]  ;;  %v406_v14 = vld [vmem:[#allocation7 + $0x4] sm:$0x3] }
  0x7e   : > { %v365_v1 = vmul.f32 %v721_v52, %v364_v58 }
  0x7f   : > { %v378_v2 = vsel %vm1085_vm6, %v377_v59, 0.0  ;;  %v395_v3 = vsel %vm1095_vm8, %v394_v60, 0.0  ;;  %v413_v4 = vsel %vm1104_vm9, %v412_v62, 0.0  ;;  %v431_v5 = vsel %vm1112_vm10, %v430_v0, 0.0 }
  0x80   : > { %v379_v6 = vadd.f32 %v378_v2, %v376_v56  ;;  %v396_v8 = vadd.f32 %v395_v3, %v393_v57  ;;  %v414_v9 = vadd.f32 %v413_v4, %v411_v61  ;;  %v432_v10 = vadd.f32 %v431_v5, %v429_v63 }
  0x81   : > { %v366_v13 = vsel %vm329_vm2, %v365_v1, 0.0 }
  0x82   : > { %380 = vst [vmem:[#allocation8] sm:$0x3] %v379_v6  ;;  %397 = vst [vmem:[#allocation8 + $0x2] sm:$0x3] %v396_v8  ;;  %v373_v16 = vmul.f32 %v711_v44, %v366_v13  ;;  %v389_v17 = vmul.f32 %v713_v45, %v366_v13  ;;  %v407_v18 = vmul.f32 %v715_v46, %v366_v13 }
  0x83   : > { %415 = vst [vmem:[#allocation8 + $0x4] sm:$0x3] %v414_v9  ;;  %433 = vst [vmem:[#allocation8 + $0x6] sm:$0x3] %v432_v10  ;;  %v425_v19 = vmul.f32 %v717_v48, %v366_v13 }
  0x84   : > { %791 = shalt.err (!%p788_p11)
}
  0x85   : > { %s923_s14 = smov 32   ;;  %s924_s15 = smov 2   ;;  %v374_v7 = vadd.f32 %v373_v16, %v372_v11  ;;  %v390_v20 = vadd.f32 %v389_v17, %v388_v12  ;;  %v408_v21 = vadd.f32 %v407_v18, %v406_v14  ;;  %v426_v22 = vadd.f32 %v425_v19, %v424_v15 }
  0x86   : > { %630 = dma.vmem_to_hbm [thread:$0]  (%p1131_p7), %s465_s26, 128, %s1218_s3, [#allocation9], %s923_s14, %s923_s14, %s924_s15  }
  0x87   : > { %s802_s11 = scalar_lea.vmem %s1145_s8, 128  ;;  %p809_p1 = scmp.lt.s32.totalorder %s1145_s8, %s1145_s8 }
  0x88   : > { %p803_p12 = scmp.ne.s32.totalorder %s1145_s8, %s802_s11  ;;  %p810_p2 = scmp.lt.s32.totalorder %s802_s11, %s802_s11 }
  0x8a   : > { %p804_p13 = pnand %p803_p12, %p1131_p7  ;;  %p811_p9 = por %p810_p2, %p809_p1 }
  0x8c   : > { %p805_p0 = pneg %p804_p13 }
  0x8e   : > { %p812_p10 = pnand %p811_p9, %p805_p0 }
  0x90   : > { %815 = shalt.err (!%p812_p10)
}
  0x91   : > { %632 = dma.vmem_to_hbm [thread:$0]  (%p1131_p7), %s1145_s8, 128, %s1219_s4, [#allocation9], %s923_s14, %s923_s14, %s924_s15   ;;  %375 = vst [vmem:[#allocation7] sm:$0x3] %v374_v7  ;;  %391 = vst [vmem:[#allocation7 + $0x2] sm:$0x3] %v390_v20 }
  0x92   : > { %409 = vst [vmem:[#allocation7 + $0x4] sm:$0x3] %v408_v21  ;;  %427 = vst [vmem:[#allocation7 + $0x6] sm:$0x3] %v426_v22  ;;  %s826_s24 = scalar_lea.vmem %s1147_s13, 128  ;;  %p833_p6 = scmp.lt.s32.totalorder %s1147_s13, %s1147_s13 }
  0x93   : > { %p827_p3 = scmp.ne.s32.totalorder %s1147_s13, %s826_s24  ;;  %p834_p8 = scmp.lt.s32.totalorder %s826_s24, %s826_s24 }
  0x95   : > { %p828_p4 = pnand %p827_p3, %p1131_p7  ;;  %p835_p11 = por %p834_p8, %p833_p6 }
  0x97   : > { %p829_p5 = pneg %p828_p4 }
  0x99   : > { %p836_p12 = pnand %p835_p11, %p829_p5 }
  0x9b   : > { %839 = shalt.err (!%p836_p12)
}
  0x9c   : > { %628 = dma.vmem_to_hbm [thread:$0]  (%p1131_p7), %s1147_s13, 128, %s1217_s2, [#allocation4], %s923_s14, %s923_s14, %s924_s15  }
  0x9d   : > { %883 = dma.done.wait (%p1131_p7), [#allocation4], 128  }
  0x9e   : > { %885 = vsyncadd (%p1131_p7), [#allocation4], 4294967168 }
  0x9f   : > { %887 = dma.done.wait (%p1131_p7), [#allocation9], 256  }
  0xa0   : > { %889 = vsyncadd (%p1131_p7), [#allocation9], 4294967040 }
  0xa1 PF: > { %s23_s20 = sadd.s32 1, %s912_s20   ;;  %s1235_s15 = smov %s896_s16 }
  0xa2   : > { %p20_p13 = scmp.ge.s32.totalorder %s23_s20, 4   ;;  %s1236_s16 = smov %s900_s17 }
  0xa3   : > { %s1237_s17 = smov %s1001_s27  ;;  %s1238_s18 = smov %s908_s19 }
  0xa4   : > { %s1239_s19 = smov %s1241_s22  ;;  %22 = sbr.rel (!%p20_p13) target bundleno = 8 (0x8), region = 113 }
  0xa9   :  { %504 = vsyncpa [#allocation3], 1 }
  0xaa   :  { %506 = vsyncpa [#allocation3 + $0x1], 1 }
  0xab   :  { %507 = vsyncpa [#allocation6], 1 }
  0xac   :  { %509 = vsyncpa [#allocation6 + $0x1], 1 }
  0xad   :  { %510 = vsyncpa [#allocation4], 1 }
  0xae   :  { %512 = vsyncpa [#allocation4 + $0x1], 1 }
  0xaf   :  { %513 = vsyncpa [#allocation9], 1 }

</bundles_post_ra>
